<compile_context>
chip_gen: v5e
topology: v5e:2x2
jax: 0.10.0
libtpu: 0.0.40
codegen_flags: <defaults>
</compile_context>

<pallas_src>
import jax
import jax.numpy as jnp
from jax.experimental import pallas as pl
from jax.experimental.pallas import tpu as pltpu


def _copy_kernel(x_ref, o_ref):
    # Straight lane-dense copy of a (TILE_N, C*H*W) block. No reshape here.
    o_ref[...] = x_ref[...]


def _choose_tile_n(n, feat, itemsize, target_bytes=2 * 1024 * 1024):
    """Pick a row-tile so each block is ~1-2 MiB and sublane-aligned."""
    tile_n = max(1, target_bytes // max(1, feat * itemsize))
    if tile_n >= n:
        # Full extent along N always satisfies the tiling constraint.
        return n
    # Round down to a multiple of 8 (sublane alignment); Pallas masks the
    # ragged final block if N % tile_n != 0.
    tile_n = max(8, (tile_n // 8) * 8)
    return min(tile_n, n)


def unflatten(x, channel, height, width):
    """Pallas equivalent of Unflatten(channel, height, width).forward(x).

    x: (N, channel*height*width) array.
    returns: (N, channel, height, width) array, same dtype.
    """
    n, feat = x.shape
    assert feat == channel * height * width, (
        f"cannot view {x.shape} as ({n},{channel},{height},{width})")

    itemsize = jnp.dtype(x.dtype).itemsize
    tile_n = _choose_tile_n(n, feat, itemsize)
    grid = (pl.cdiv(n, tile_n),)

    flat_out = pl.pallas_call(
        _copy_kernel,
        out_shape=jax.ShapeDtypeStruct((n, feat), x.dtype),
        grid=grid,
        in_specs=[pl.BlockSpec((tile_n, feat), lambda i: (i, 0))],
        out_specs=pl.BlockSpec((tile_n, feat), lambda i: (i, 0)),
        compiler_params=pltpu.CompilerParams(
            dimension_semantics=("parallel",),
        ),
        cost_estimate=pl.CostEstimate(
            flops=0,
            transcendentals=0,
            bytes_accessed=2 * n * feat * itemsize,
        ),
    )(x)

    # The actual "unflatten": a free, metadata-only view outside the kernel.
    return flat_out.reshape(n, channel, height, width)


if __name__ == "__main__":
    # Module config (no learnable parameters to initialize).
    channel, height, width = 4, 16, 16
    batch = 2

    key = jax.random.PRNGKey(0)
    x = jax.random.normal(key, (batch, channel * height * width),
                          dtype=jnp.float32)

    out = unflatten(x, channel, height, width)
    out = jax.block_until_ready(out)

    # Reference: plain reshape (exactly what torch .view does).
    ref = x.reshape(batch, channel, height, width)

    assert out.shape == (batch, channel, height, width), out.shape
    assert out.dtype == x.dtype, out.dtype
    assert jnp.array_equal(out, ref), "mismatch vs. reference reshape"

    print("KERNEL_OK")
</pallas_src>

<mosaic_0001>
module attributes {stable_mosaic.version = 11 : i64} {
  func.func @_copy_kernel(%arg0: i32, %arg1: memref<2x1024xf32, #tpu.memory_space<vmem>>, %arg2: memref<2x1024xf32, #tpu.memory_space<vmem>>) attributes {dimension_semantics = [#tpu.dimension_semantics<parallel>], iteration_bounds = array<i64: 1>, scalar_prefetch = 0 : i64, scratch_operands = 0 : i64, tpu.core_type = #tpu.core_type<tc>, window_params = [{transform_indices = @transform_0, window_bounds = array<i64: 2, 1024>}, {transform_indices = @transform_1, window_bounds = array<i64: 2, 1024>}]} {
    %c0 = arith.constant 0 : index
    %c0_0 = arith.constant 0 : index
    %0 = vector.load %arg1[%c0, %c0_0] : memref<2x1024xf32, #tpu.memory_space<vmem>>, vector<2x1024xf32>
    %c0_1 = arith.constant 0 : index
    %c0_2 = arith.constant 0 : index
    %1 = vector.load %arg2[%c0_1, %c0_2] : memref<2x1024xf32, #tpu.memory_space<vmem>>, vector<2x1024xf32>
    tpu.vector_store %arg2[%c0_1, %c0_2], %0 {strides = array<i32>} : memref<2x1024xf32, #tpu.memory_space<vmem>>, vector<2x1024xf32>,
    return
  }
  func.func @transform_0(%arg0: i32) -> (i32, i32) {
    %c0_i32 = arith.constant 0 : i32
    %c0_i32_0 = arith.constant 0 : i32
    return %arg0, %c0_i32 : i32, i32
  }
  func.func @transform_1(%arg0: i32) -> (i32, i32) {
    %c0_i32 = arith.constant 0 : i32
    %c0_i32_0 = arith.constant 0 : i32
    return %arg0, %c0_i32 : i32, i32
  }
}

</mosaic_0001>

<bundles_post_ra>
// kernel: tpu_custom_call.1
= control target key start
LH: loop header
LB: loop body
LE: loop exit
PB: predicated region body
PF: predicated region fallthrough
CT: control target
= control target key end

     0   :  { %6 = vsyncpa [#allocation3], 0  ;;  %s116_s0 = inlined_call_operand.hbm [shape: f32[2,1024], index: 0, kind: input, shape index: {}]   ;;  %s117_s1 = inlined_call_operand.hbm [shape: f32[2,1024], index: 1, kind: output, shape index: {}]  }
   0x1   :  { %7 = vsyncpa [#allocation4], 0  ;;  %s13_s8 = sshll.u32 %s116_s0, 4  ;;  %s98_s9 = smov [#allocation2]   ;;  %s14_s8 = int_to_ptr.hbm [resolvable:$true] %s13_s8 }
   0x2   :  { %s15_s10 = sshll.u32 %s98_s9, 4  ;;  %s16_s10 = int_to_ptr.vmem [resolvable:$true] %s15_s10 }
   0x3   :  { %18 = dma.hbm_to_vmem [thread:$0]  %s14_s8, 256, %s16_s10, [#allocation3]  }
   0x4   :  { %94 = dma.done.wait [#allocation3], 256  }
   0x5   :  { %95 = vsyncadd [#allocation3], 4294967040  ;;  %s99_s11 = smov [#allocation5]   ;;  %s34_s15 = sshll.u32 %s117_s1, 4  ;;  %v23_v0 = vld [vmem:[#allocation2] sm:$0xff]  ;;  %v24_v1 = vld [vmem:[#allocation2 + $0x8] sm:$0xff]  ;;  %s35_s15 = int_to_ptr.hbm [resolvable:$true] %s34_s15 }
   0x6   :  { %s32_s12 = sshll.u32 %s99_s11, 4  ;;  %25 = vst [vmem:[#allocation5] sm:$0xff] %v23_v0  ;;  %s33_s12 = int_to_ptr.vmem [resolvable:$true] %s32_s12 }
   0x7   :  { %26 = vst [vmem:[#allocation5 + $0x8] sm:$0xff] %v24_v1 }
   0x8   :  { %37 = dma.vmem_to_hbm [thread:$0]  %s33_s12, 256, %s35_s15, [#allocation4]  }
   0x9   :  { %96 = dma.done.wait [#allocation4], 256  }
   0xa   :  { %97 = vsyncadd [#allocation4], 4294967040 }
   0xb   :  { %42 = vsyncpa [#allocation3], 1 }
   0xc   :  { %43 = vsyncpa [#allocation4], 1 }

</bundles_post_ra>
